<compile_context>
chip_gen: v7x
topology: tpu7x:2x2x1
jax: 0.10.0
libtpu: 0.0.40
codegen_flags: <defaults>
</compile_context>

<pallas_src>
import functools

import jax
import jax.numpy as jnp
from jax.experimental import pallas as pl
from jax.experimental.pallas import tpu as pltpu


def _round_up(x: int, m: int) -> int:
    return ((x + m - 1) // m) * m


def _pad2(x, rows: int, cols: int):
    return jnp.pad(x, ((0, rows - x.shape[0]), (0, cols - x.shape[1])))


# --------------------------------------------------------------------------- #
# Kernel
# --------------------------------------------------------------------------- #
def _ppo_kernel(action_dim,
                state_ref, w1_ref, b1_ref, w2_ref, b2_ref, wh_ref, bh_ref,
                out_ref):
    """One batch tile: feature MLP + fused (actor_mean | critic) heads."""
    x = state_ref[...]                                               # (TB, S) bf16

    # feature_extractor: Linear -> ReLU -> Linear -> ReLU (f32 accumulation)
    h = jnp.dot(x, w1_ref[...], preferred_element_type=jnp.float32) + b1_ref[...]
    h = jnp.maximum(h, 0.0)
    h = jnp.dot(h.astype(w2_ref.dtype), w2_ref[...],
                preferred_element_type=jnp.float32) + b2_ref[...]
    h = jnp.maximum(h, 0.0)                                          # (TB, Hp) f32

    # fused heads: columns [0, A) -> tanh(actor_mean), column A -> value.
    head = jnp.dot(h.astype(wh_ref.dtype), wh_ref[...],
                   preferred_element_type=jnp.float32) + bh_ref[...]  # (TB, OUT)
    col = jax.lax.broadcasted_iota(jnp.int32, head.shape, 1)
    out_ref[...] = jnp.where(col < action_dim, jnp.tanh(head), head)


# --------------------------------------------------------------------------- #
# Parameter packing (do once per weight update, not per forward)
# --------------------------------------------------------------------------- #
def pack_params(params, matmul_dtype=jnp.bfloat16):
    """Pad to 128-lane tiles, fuse the two heads, cast matmul operands."""
    S = params["w1"].shape[0]
    H = params["w1"].shape[1]
    A = params["wm"].shape[1]
    Hp = _round_up(H, 128)          # lane-dense hidden width
    OUT = _round_up(A + 1, 128)     # fused (mean | value) output slab width

    packed = dict(
        w1=_pad2(params["w1"], S, Hp).astype(matmul_dtype),
        b1=_pad2(params["b1"], 1, Hp),
        w2=_pad2(params["w2"], Hp, Hp).astype(matmul_dtype),
        b2=_pad2(params["b2"], 1, Hp),
        wh=_pad2(jnp.concatenate([params["wm"], params["wc"]], axis=1),
                 Hp, OUT).astype(matmul_dtype),
        bh=_pad2(jnp.concatenate([params["bm"], params["bc"]], axis=1),
                 1, OUT),
        log_std=params["log_std"],
    )
    meta = dict(state_dim=S, action_dim=A, hidden_pad=Hp, out_pad=OUT,
                matmul_dtype=matmul_dtype)
    return packed, meta


# --------------------------------------------------------------------------- #
# Forward
# --------------------------------------------------------------------------- #
def ppo_forward_packed(state, packed, meta, *, tb_max=256):
    """Forward with pre-packed params.  Returns (action_mean, action_log_std, value)."""
    B, S = state.shape
    assert S == meta["state_dim"]
    A = meta["action_dim"]
    Hp = meta["hidden_pad"]
    OUT = meta["out_pad"]
    matmul_dtype = meta["matmul_dtype"]

    # ---- batch tiling -------------------------------------------------------
    TB = min(tb_max, _round_up(B, 8))
    B_pad = _round_up(B, TB)
    x = state.astype(matmul_dtype)
    if B_pad != B:
        x = jnp.pad(x, ((0, B_pad - B), (0, 0)))

    resident = lambda i: (0, 0)     # weights/biases: same block every grid step
    out = pl.pallas_call(
        functools.partial(_ppo_kernel, A),
        out_shape=jax.ShapeDtypeStruct((B_pad, OUT), jnp.float32),
        grid=(B_pad // TB,),
        in_specs=[
            pl.BlockSpec((TB, S), lambda i: (i, 0)),     # state tile
            pl.BlockSpec((S, Hp), resident),             # w1
            pl.BlockSpec((1, Hp), resident),             # b1
            pl.BlockSpec((Hp, Hp), resident),            # w2
            pl.BlockSpec((1, Hp), resident),              # b2
            pl.BlockSpec((Hp, OUT), resident),            # fused head weights
            pl.BlockSpec((1, OUT), resident),             # fused head bias
        ],
        out_specs=pl.BlockSpec((TB, OUT), lambda i: (i, 0)),
        compiler_params=pltpu.CompilerParams(
            dimension_semantics=("parallel",)),           # v7x megacore over batch
    )(x, packed["w1"], packed["b1"], packed["w2"], packed["b2"],
      packed["wh"], packed["bh"])

    action_mean = out[:B, :A]
    value = out[:B, A:A + 1]
    # actor_log_std.expand_as(action_mean): pure parameter broadcast, no kernel traffic.
    action_log_std = jnp.broadcast_to(packed["log_std"], action_mean.shape)
    return action_mean, action_log_std, value


def ppo_forward(state, params, *, matmul_dtype=jnp.bfloat16, tb_max=256):
    """Convenience wrapper: pack + forward.  Matches PPONetwork.forward."""
    packed, meta = pack_params(params, matmul_dtype)
    return ppo_forward_packed(state, packed, meta, tb_max=tb_max)


# --------------------------------------------------------------------------- #
# Init + reference
# --------------------------------------------------------------------------- #
def init_params(key, state_dim, action_dim, hidden_dim):
    """Deterministic init mimicking nn.Linear (uniform +-1/sqrt(fan_in))."""
    def linear(k, fan_in, fan_out):
        kw, kb = jax.random.split(k)
        bound = 1.0 / jnp.sqrt(jnp.float32(fan_in))
        w = jax.random.uniform(kw, (fan_in, fan_out), jnp.float32, -bound, bound)
        b = jax.random.uniform(kb, (1, fan_out), jnp.float32, -bound, bound)
        return w, b

    k1, k2, k3, k4 = jax.random.split(key, 4)
    w1, b1 = linear(k1, state_dim, hidden_dim)
    w2, b2 = linear(k2, hidden_dim, hidden_dim)
    wm, bm = linear(k3, hidden_dim, action_dim)
    wc, bc = linear(k4, hidden_dim, 1)
    log_std = jnp.zeros((1, action_dim), jnp.float32)   # nn.Parameter(torch.zeros(1, A))
    return dict(w1=w1, b1=b1, w2=w2, b2=b2, wm=wm, bm=bm, wc=wc, bc=bc,
                log_std=log_std)


def ppo_forward_ref(state, p, matmul_dtype=jnp.float32):
    """Plain-JAX reference. matmul_dtype=bf16 mirrors the kernel's cast points."""
    c = lambda t: t.astype(matmul_dtype)
    h = jnp.dot(c(state), c(p["w1"]), preferred_element_type=jnp.float32) + p["b1"]
    h = jnp.maximum(h, 0.0)
    h = jnp.dot(c(h), c(p["w2"]), preferred_element_type=jnp.float32) + p["b2"]
    h = jnp.maximum(h, 0.0)
    mean = jnp.tanh(jnp.dot(c(h), c(p["wm"]), preferred_element_type=jnp.float32) + p["bm"])
    value = jnp.dot(c(h), c(p["wc"]), preferred_element_type=jnp.float32) + p["bc"]
    log_std = jnp.broadcast_to(p["log_std"], mean.shape)
    return mean, log_std, value


if __name__ == "__main__":
    B, STATE_DIM, ACTION_DIM, HIDDEN_DIM = 8, 16, 8, 32

    key = jax.random.PRNGKey(0)
    k_state, k_params = jax.random.split(key)
    state = jax.random.normal(k_state, (B, STATE_DIM), jnp.float32)
    params = init_params(k_params, STATE_DIM, ACTION_DIM, HIDDEN_DIM)

    mean, log_std, value = jax.block_until_ready(
        jax.jit(ppo_forward)(state, params))

    assert mean.shape == (B, ACTION_DIM)
    assert log_std.shape == (B, ACTION_DIM)
    assert value.shape == (B, 1)

    # Numerics check: reference with the same bf16 matmul-input casts (tight).
    m_bf, _, v_bf = ppo_forward_ref(state, params, jnp.bfloat16)
    assert jnp.allclose(mean, m_bf, atol=2e-3), "mean mismatch vs bf16-matched ref"
    assert jnp.allclose(value, v_bf, atol=2e-3), "value mismatch vs bf16-matched ref"

    # Semantics check: full-f32 reference (loose tolerance covers bf16 rounding).
    m_32, ls_32, v_32 = ppo_forward_ref(state, params, jnp.float32)
    assert jnp.allclose(log_std, ls_32)
    assert jnp.allclose(mean, m_32, atol=5e-2, rtol=5e-2)
    assert jnp.allclose(value, v_32, atol=5e-2, rtol=5e-2)

    print("KERNEL_OK")
</pallas_src>

<mosaic_0001>
module attributes {stable_mosaic.version = 11 : i64} {
  func.func @_ppo_kernel(%arg0: i32, %arg1: memref<8x16xbf16, #tpu.memory_space<vmem>>, %arg2: memref<16x128xbf16, #tpu.memory_space<vmem>>, %arg3: memref<1x128xf32, #tpu.memory_space<vmem>>, %arg4: memref<128x128xbf16, #tpu.memory_space<vmem>>, %arg5: memref<1x128xf32, #tpu.memory_space<vmem>>, %arg6: memref<128x128xbf16, #tpu.memory_space<vmem>>, %arg7: memref<1x128xf32, #tpu.memory_space<vmem>>, %arg8: memref<8x128xf32, #tpu.memory_space<vmem>>) attributes {dimension_semantics = [#tpu.dimension_semantics<parallel>], iteration_bounds = array<i64: 1>, scalar_prefetch = 0 : i64, scratch_operands = 0 : i64, tpu.core_type = #tpu.core_type<tc>, window_params = [{transform_indices = @transform_0, window_bounds = array<i64: 8, 16>}, {pipeline_mode = #tpu.pipeline_mode<synchronous>, transform_indices = @transform_1, window_bounds = array<i64: 16, 128>}, {pipeline_mode = #tpu.pipeline_mode<synchronous>, transform_indices = @transform_2, window_bounds = array<i64: 1, 128>}, {pipeline_mode = #tpu.pipeline_mode<synchronous>, transform_indices = @transform_3, window_bounds = array<i64: 128, 128>}, {pipeline_mode = #tpu.pipeline_mode<synchronous>, transform_indices = @transform_4, window_bounds = array<i64: 1, 128>}, {pipeline_mode = #tpu.pipeline_mode<synchronous>, transform_indices = @transform_5, window_bounds = array<i64: 128, 128>}, {pipeline_mode = #tpu.pipeline_mode<synchronous>, transform_indices = @transform_6, window_bounds = array<i64: 1, 128>}, {transform_indices = @transform_7, window_bounds = array<i64: 8, 128>}]} {
    %c0 = arith.constant 0 : index
    %c0_0 = arith.constant 0 : index
    %0 = vector.load %arg1[%c0, %c0_0] : memref<8x16xbf16, #tpu.memory_space<vmem>>, vector<8x16xbf16>
    %c0_1 = arith.constant 0 : index
    %c0_2 = arith.constant 0 : index
    %1 = vector.load %arg2[%c0_1, %c0_2] : memref<16x128xbf16, #tpu.memory_space<vmem>>, vector<16x128xbf16>
    %cst = arith.constant dense<0.000000e+00> : vector<8x128xf32>
    %2 = tpu.matmul %0, %1, %cst {dimension_numbers = #tpu.dot_dimension_numbers<[1], [0], [0], [1], [0, 0, 1, 1], [], []>} : vector<8x16xbf16>, vector<16x128xbf16>, vector<8x128xf32> -> vector<8x128xf32>
    %c0_3 = arith.constant 0 : index
    %c0_4 = arith.constant 0 : index
    %3 = vector.load %arg3[%c0_3, %c0_4] : memref<1x128xf32, #tpu.memory_space<vmem>>, vector<1x128xf32>
    %4 = vector.broadcast %3 : vector<1x128xf32> to vector<8x128xf32>
    %5 = arith.addf %2, %4 : vector<8x128xf32>
    %cst_5 = arith.constant 0.000000e+00 : f32
    %6 = vector.broadcast %cst_5 : f32 to vector<8x128xf32>
    %7 = arith.maximumf %5, %6 : vector<8x128xf32>
    %8 = arith.truncf %7 : vector<8x128xf32> to vector<8x128xbf16>
    %c0_6 = arith.constant 0 : index
    %c0_7 = arith.constant 0 : index
    %9 = vector.load %arg4[%c0_6, %c0_7] : memref<128x128xbf16, #tpu.memory_space<vmem>>, vector<128x128xbf16>
    %cst_8 = arith.constant dense<0.000000e+00> : vector<8x128xf32>
    %10 = tpu.matmul %8, %9, %cst_8 {dimension_numbers = #tpu.dot_dimension_numbers<[1], [0], [0], [1], [0, 0, 1, 1], [], []>} : vector<8x128xbf16>, vector<128x128xbf16>, vector<8x128xf32> -> vector<8x128xf32>
    %c0_9 = arith.constant 0 : index
    %c0_10 = arith.constant 0 : index
    %11 = vector.load %arg5[%c0_9, %c0_10] : memref<1x128xf32, #tpu.memory_space<vmem>>, vector<1x128xf32>
    %12 = vector.broadcast %11 : vector<1x128xf32> to vector<8x128xf32>
    %13 = arith.addf %10, %12 : vector<8x128xf32>
    %cst_11 = arith.constant 0.000000e+00 : f32
    %14 = vector.broadcast %cst_11 : f32 to vector<8x128xf32>
    %15 = arith.maximumf %13, %14 : vector<8x128xf32>
    %16 = arith.truncf %15 : vector<8x128xf32> to vector<8x128xbf16>
    %c0_12 = arith.constant 0 : index
    %c0_13 = arith.constant 0 : index
    %17 = vector.load %arg6[%c0_12, %c0_13] : memref<128x128xbf16, #tpu.memory_space<vmem>>, vector<128x128xbf16>
    %cst_14 = arith.constant dense<0.000000e+00> : vector<8x128xf32>
    %18 = tpu.matmul %16, %17, %cst_14 {dimension_numbers = #tpu.dot_dimension_numbers<[1], [0], [0], [1], [0, 0, 1, 1], [], []>} : vector<8x128xbf16>, vector<128x128xbf16>, vector<8x128xf32> -> vector<8x128xf32>
    %c0_15 = arith.constant 0 : index
    %c0_16 = arith.constant 0 : index
    %19 = vector.load %arg7[%c0_15, %c0_16] : memref<1x128xf32, #tpu.memory_space<vmem>>, vector<1x128xf32>
    %20 = vector.broadcast %19 : vector<1x128xf32> to vector<8x128xf32>
    %21 = arith.addf %18, %20 : vector<8x128xf32>
    %22 = tpu.iota {dimensions = array<i32: 1>} : vector<8x128xi32>
    %c8_i32 = arith.constant 8 : i32
    %23 = vector.broadcast %c8_i32 : i32 to vector<8x128xi32>
    %24 = arith.cmpi slt, %22, %23 : vector<8x128xi32>
    %25 = math.tanh %21 : vector<8x128xf32>
    %26 = arith.select %24, %25, %21 : vector<8x128xi1>, vector<8x128xf32>
    %c0_17 = arith.constant 0 : index
    %c0_18 = arith.constant 0 : index
    %27 = vector.load %arg8[%c0_17, %c0_18] : memref<8x128xf32, #tpu.memory_space<vmem>>, vector<8x128xf32>
    tpu.vector_store %arg8[%c0_17, %c0_18], %26 {strides = array<i32>} : memref<8x128xf32, #tpu.memory_space<vmem>>, vector<8x128xf32>,
    return
  }
  func.func @transform_0(%arg0: i32) -> (i32, i32) {
    %c0_i32 = arith.constant 0 : i32
    %c0_i32_0 = arith.constant 0 : i32
    return %arg0, %c0_i32 : i32, i32
  }
  func.func @transform_1(%arg0: i32) -> (i32, i32) {
    %c0_i32 = arith.constant 0 : i32
    %c0_i32_0 = arith.constant 0 : i32
    %c0_i32_1 = arith.constant 0 : i32
    return %c0_i32, %c0_i32_0 : i32, i32
  }
  func.func @transform_2(%arg0: i32) -> (i32, i32) {
    %c0_i32 = arith.constant 0 : i32
    %c0_i32_0 = arith.constant 0 : i32
    %c0_i32_1 = arith.constant 0 : i32
    return %c0_i32, %c0_i32_0 : i32, i32
  }
  func.func @transform_3(%arg0: i32) -> (i32, i32) {
    %c0_i32 = arith.constant 0 : i32
    %c0_i32_0 = arith.constant 0 : i32
    %c0_i32_1 = arith.constant 0 : i32
    return %c0_i32, %c0_i32_0 : i32, i32
  }
  func.func @transform_4(%arg0: i32) -> (i32, i32) {
    %c0_i32 = arith.constant 0 : i32
    %c0_i32_0 = arith.constant 0 : i32
    %c0_i32_1 = arith.constant 0 : i32
    return %c0_i32, %c0_i32_0 : i32, i32
  }
  func.func @transform_5(%arg0: i32) -> (i32, i32) {
    %c0_i32 = arith.constant 0 : i32
    %c0_i32_0 = arith.constant 0 : i32
    %c0_i32_1 = arith.constant 0 : i32
    return %c0_i32, %c0_i32_0 : i32, i32
  }
  func.func @transform_6(%arg0: i32) -> (i32, i32) {
    %c0_i32 = arith.constant 0 : i32
    %c0_i32_0 = arith.constant 0 : i32
    %c0_i32_1 = arith.constant 0 : i32
    return %c0_i32, %c0_i32_0 : i32, i32
  }
  func.func @transform_7(%arg0: i32) -> (i32, i32) {
    %c0_i32 = arith.constant 0 : i32
    %c0_i32_0 = arith.constant 0 : i32
    return %arg0, %c0_i32 : i32, i32
  }
}

</mosaic_0001>

<bundles_post_ra>
// kernel: ppo_forward.1
= control target key start
LH: loop header
LB: loop body
LE: loop exit
PB: predicated region body
PF: predicated region fallthrough
CT: control target
= control target key end

     0   :  { %v431_v0 = vmov 0.0   ;;  %vm432_vm0 = vmmov 0   ;;  %vm43_vm1 = vcmask 130048   ;;  %v313_v40 = vlaneseq  ;;  %s559_s1 = inlined_call_operand.vmem [shape: bf16[16,128], index: 1, kind: input, shape index: {}]   ;;  %s560_s0 = inlined_call_operand.vmem [shape: bf16[8,16], index: 0, kind: input, shape index: {}]   ;;  %s561_s3 = inlined_call_operand.vmem [shape: bf16[128,128], index: 3, kind: input, shape index: {}]   ;;  %s562_s5 = inlined_call_operand.vmem [shape: bf16[128,128], index: 5, kind: input, shape index: {}]   ;;  %s563_s2 = inlined_call_operand.vmem [shape: f32[1,128], index: 2, kind: input, shape index: {}]   ;;  %s564_s4 = inlined_call_operand.vmem [shape: f32[1,128], index: 4, kind: input, shape index: {}]   ;;  %s565_s6 = inlined_call_operand.vmem [shape: f32[1,128], index: 6, kind: input, shape index: {}]   ;;  %s566_s7 = inlined_call_operand.vmem [shape: f32[8,128], index: 7, kind: output, shape index: {}]  }
   0x1   :  { %364 = vmatprep.subr.bf16.mxu0 %v431_v0  ;;  %v412_v1 = vld [vmem:[%s559_s1] sm:$0xff]   ;;  %366 = vmatprep.mubr.msk.bf16.mxu0 %vm432_vm0, %v431_v0  ;;  %v414_v4 = vld [vmem:[%s561_s3 + $0x8] sm:$0xff]   ;;  %v415_v5 = vld [vmem:[%s561_s3 + $0x10] sm:$0xff]  }
   0x2   :  { %v27_v2 = vld [vmem:[%s560_s0] sm:$0xf]  ;;  %370 = vmatprep.subr.bf16.mxu1 %v431_v0  ;;  %386 = vmatprep.mubr.msk.bf16.mxu1 %vm432_vm0, %v431_v0  ;;  %v416_v6 = vld [vmem:[%s561_s3 + $0x18] sm:$0xff]   ;;  %v418_v8 = vld [vmem:[%s561_s3 + $0x28] sm:$0xff]   ;;  %v314_v42 = vand.u32 127, %v313_v40 }
   0x3   :  { %365 = vmatpush3.bf16.msra.mxu0 %v412_v1  ;;  %v413_v3 = vld [vmem:[%s561_s3] sm:$0xff]   ;;  %v419_v9 = vld [vmem:[%s561_s3 + $0x30] sm:$0xff]   ;;  %v420_v10 = vld [vmem:[%s561_s3 + $0x38] sm:$0xff]  }
   0x4   :  { %390 = vmatprep.subr.bf16.mxu0 %v431_v0  ;;  %371 = vmatpush3.bf16.msra.mxu1 %v413_v3  ;;  %v417_v7 = vld [vmem:[%s561_s3 + $0x20] sm:$0xff]   ;;  %v422_v12 = vld [vmem:[%s562_s5 + $0x8] sm:$0xff]   ;;  %v423_v13 = vld [vmem:[%s562_s5 + $0x10] sm:$0xff]   ;;  %vm315_vm2 = vcmp.lt.s32.totalorder %v314_v42, 8 }
   0x5   :  { %372 = vmatprep.subr.bf16.mxu1 %v431_v0  ;;  %v421_v11 = vld [vmem:[%s562_s5] sm:$0xff]   ;;  %v424_v14 = vld [vmem:[%s562_s5 + $0x18] sm:$0xff]   ;;  %v426_v16 = vld [vmem:[%s562_s5 + $0x28] sm:$0xff]  }
   0x6   :  { %367 = vmatmul.mubr.msk.bf16.vlgmr.msra.gmra.mrb[0].mxu0 %vm43_vm1, %v27_v2  ;;  %v425_v15 = vld [vmem:[%s562_s5 + $0x20] sm:$0xff]   ;;  %v427_v25 = vld [vmem:[%s562_s5 + $0x30] sm:$0xff]   ;;  %v428_v26 = vld [vmem:[%s562_s5 + $0x38] sm:$0xff]  }
   0x7   :  { %406 = vmatprep.mubr.msk.bf16.mxu0 %vm432_vm0, %v431_v0  ;;  %391 = vmatpush3.bf16.msra.mxu0 %v421_v11  ;;  %v323_v17 = vld [vmem:[%s563_s2] ss:$0 sm:$0xff] }
   0x8   :  { %373 = vmatpush3.bf16.msra.mxu1 %v414_v4  ;;  %392 = vmatprep.subr.bf16.mxu0 %v431_v0  ;;  %v326_v27 = vld [vmem:[%s564_s4] ss:$0 sm:$0xff] }
   0x9   :  { %374 = vmatprep.subr.bf16.mxu1 %v431_v0  ;;  %v335_v35 = vld [vmem:[%s565_s6] ss:$0 sm:$0xff] }
   0xb   :  { %393 = vmatpush3.bf16.msra.mxu0 %v422_v12 }
   0xc   :  { %375 = vmatpush3.bf16.msra.mxu1 %v415_v5  ;;  %394 = vmatprep.subr.bf16.mxu0 %v431_v0 }
   0xd   :  { %376 = vmatprep.subr.bf16.mxu1 %v431_v0 }
   0xf   :  { %395 = vmatpush3.bf16.msra.mxu0 %v423_v13 }
  0x10   :  { %377 = vmatpush3.bf16.msra.mxu1 %v416_v6  ;;  %396 = vmatprep.subr.bf16.mxu0 %v431_v0 }
  0x11   :  { %378 = vmatprep.subr.bf16.mxu1 %v431_v0 }
  0x13   :  { %397 = vmatpush3.bf16.msra.mxu0 %v424_v14 }
  0x14   :  { %379 = vmatpush3.bf16.msra.mxu1 %v417_v7  ;;  %398 = vmatprep.subr.bf16.mxu0 %v431_v0 }
  0x15   :  { %380 = vmatprep.subr.bf16.mxu1 %v431_v0 }
  0x17   :  { %399 = vmatpush3.bf16.msra.mxu0 %v425_v15 }
  0x18   :  { %381 = vmatpush3.bf16.msra.mxu1 %v418_v8  ;;  %400 = vmatprep.subr.bf16.mxu0 %v431_v0 }
  0x19   :  { %382 = vmatprep.subr.bf16.mxu1 %v431_v0 }
  0x1b   :  { %401 = vmatpush3.bf16.msra.mxu0 %v426_v16 }
  0x1c   :  { %383 = vmatpush3.bf16.msra.mxu1 %v419_v9  ;;  %402 = vmatprep.subr.bf16.mxu0 %v431_v0 }
  0x1d   :  { %384 = vmatprep.subr.bf16.mxu1 %v431_v0 }
  0x1f   :  { %403 = vmatpush3.bf16.msra.mxu0 %v427_v25 }
  0x20   :  { %385 = vmatpush3.bf16.msra.mxu1 %v420_v10  ;;  %404 = vmatprep.subr.bf16.mxu0 %v431_v0 }
  0x23   :  { %405 = vmatpush3.bf16.msra.mxu0 %v428_v26 }
  0xd9   :  { %v81_v18 = vpop.f32.mrb[0].mxu0 }
  0xda   :  { %v82_v19 = vadd.f32 %v323_v17, %v81_v18  ;;  %v368_v20 = vpop.f32.mrb[1].mxu0 }
  0xdb   :  { %v84_v21 = vpop.f32.mrb[2].mxu0 }
  0xdc   :  { %v87_v22 = vmax.f32 %v82_v19, 0.0  ;;  %v369_v23 = vpop.f32.mrb[3].mxu0 }
  0xde   :  { %v88_v24 = vpack.c.bf16 %v87_v22, %v87_v22 }
  0xe0   :  { %387 = vmatmul.mubr.bf16.vlgmr.msra.gmra.mrb[0].mxu1 %v88_v24 }
 0x1b3   :  { %v194_v28 = vpop.f32.mrb[0].mxu1 }
 0x1b4   :  { %v195_v29 = vadd.f32 %v326_v27, %v194_v28  ;;  %v388_v30 = vpop.f32.mrb[1].mxu1 }
 0x1b5   :  { %v197_v31 = vpop.f32.mrb[2].mxu1 }
 0x1b6   :  { %v200_v32 = vmax.f32 %v195_v29, 0.0  ;;  %v389_v33 = vpop.f32.mrb[3].mxu1 }
 0x1b8   :  { %v201_v34 = vpack.c.bf16 %v200_v32, %v200_v32 }
 0x1ba   :  { %407 = vmatmul.mubr.bf16.vlgmr.msra.gmra.mrb[4].mxu0 %v201_v34 }
 0x28d   :  { %v307_v36 = vpop.f32.mrb[4].mxu0 }
 0x28e   :  { %v308_v37 = vadd.f32 %v335_v35, %v307_v36  ;;  %v408_v38 = vpop.f32.mrb[5].mxu0 }
 0x28f   :  { %v310_v39 = vpop.f32.mrb[6].mxu0 }
 0x290   :  { %429 = vtanh.f32 %v308_v37  ;;  %v409_v41 = vpop.f32.mrb[7].mxu0 }
 0x29a   :  { %v430_v43 = vpop.eup %429 }
 0x29b   :  { %v317_v44 = vsel %vm315_vm2, %v430_v43, %v308_v37 }
 0x29c   :  { %318 = vst [vmem:[%s566_s7] sm:$0xff] %v317_v44 }

</bundles_post_ra>
